<compile_context>
chip_gen: v7x
topology: tpu7x:2x2x1
jax: 0.10.0
libtpu: 0.0.40
codegen_flags: <defaults>
</compile_context>

<pallas_src>
import jax
import jax.numpy as jnp
from jax.experimental import pallas as pl
from jax.experimental.pallas import tpu as pltpu


def attn_kernel(enc_ref, hproj_ref, we_ref, v_ref, o_ref):
    # enc_ref:   (T, Bb, H)  encoder outputs in native [T, B, H] layout (bf16 ok)
    # hproj_ref: (Bb, H)     hidden @ W_h.T + b   (precomputed, f32, const over T)
    # we_ref:    (H, H)      W_e.T  (so enc @ we == enc @ W_e.T), input dtype
    # v_ref:     (1, H)      scoring vector, f32, lane-dense row
    # o_ref:     (Bb, T)     softmax(attn energies) over T (lane dim), f32
    T, Bb, H = enc_ref.shape

    # One MXU matmul over all T*Bb rows.  The (T, Bb, H) -> (T*Bb, H) collapse
    # is layout-free when Bb is a multiple of the sublane tile (8 f32 / 16 bf16),
    # which the wrapper's block_b selection guarantees for multi-block grids.
    enc2 = enc_ref[...].reshape(T * Bb, H)
    proj = jnp.dot(enc2, we_ref[...],
                   preferred_element_type=jnp.float32)                # (T*Bb, H) f32

    # Per-batch hidden contribution (broadcast over the leading T axis) + ReLU,
    # all in f32.
    energy = proj.reshape(T, Bb, H) + hproj_ref[...].astype(jnp.float32)[None, :, :]
    energy = jnp.maximum(energy, 0.0)

    # v-projection: VPU multiply + lane reduce (MXU stays free).
    vvec = v_ref[...].astype(jnp.float32)                             # (1, H)
    e = jnp.sum(energy * vvec[None, :, :], axis=-1)                   # (T, Bb)

    # Transpose only the tiny score tile (XLU), then lane softmax over T.
    scores = jnp.transpose(e)                                         # (Bb, T)
    m = jnp.max(scores, axis=-1, keepdims=True)
    p = jnp.exp(scores - m)
    denom = jnp.sum(p, axis=-1, keepdims=True)
    o_ref[...] = (p * pl.reciprocal(denom, approx=False)).astype(o_ref.dtype)


def _pick_block_b(B, T, H, enc_dtype, vmem_budget_bytes):
    """Largest batch block that (a) divides B, (b) keeps BlockSpec dims aligned
    (multiple of the sublane tile, or == B), (c) fits the VMEM budget, and
    (d) leaves >= 2 grid steps when possible (v7x has 2 TensorCores)."""
    elt = jnp.dtype(enc_dtype).itemsize
    sub = 16 if elt < 4 else 8  # sublane tile: 16 for bf16/fp8, 8 for f32

    def vmem_footprint(bb):
        enc_blk = 2 * T * bb * H * elt          # double-buffered enc block
        we      = 2 * H * H * elt               # double-buffered weight tile
        hproj   = 2 * bb * H * 4
        out     = 2 * bb * T * 4
        f32_tmp = 2 * T * bb * H * 4            # proj + energy f32 intermediates
        return enc_blk + we + hproj + out + f32_tmp

    cands = [d for d in range(1, B + 1)
             if B % d == 0 and (d % sub == 0 or d == B)]
    multi = [d for d in cands
             if B // d >= 2 and vmem_footprint(d) <= vmem_budget_bytes]
    if multi:                      # >= 2 blocks: megacore + DMA/compute overlap
        return max(multi)
    fits = [d for d in cands if vmem_footprint(d) <= vmem_budget_bytes]
    return max(fits) if fits else min(cands)


def attention_forward(hidden, encoder_outputs, W, b, v, *,
                      block_b=None, enc_buffers=None,
                      vmem_budget_bytes=40 * 1024 * 1024):
    """hidden: [B, H]; encoder_outputs: [T, B, H] (native layout, any float dtype);
    W: [H, 2H]; b: [H]; v: [H].  Returns attention weights [B, 1, T] (f32),
    matching the PyTorch module's forward."""
    T, B, H = encoder_outputs.shape
    enc = encoder_outputs                      # consume native [T, B, H]; no transpose

    # Split the Linear weight: Linear([h, enc]) == h @ W_h.T + enc @ W_e.T + b.
    # The hidden half is tiny and constant over T -> compute once, in f32.
    W_h = W[:, :H]
    W_e = W[:, H:]
    h_proj = (jnp.dot(hidden.astype(jnp.float32), W_h.astype(jnp.float32).T,
                      precision="highest")
              + b.astype(jnp.float32))                                # [B, H] f32
    We_t = W_e.T.astype(enc.dtype)                                    # [H, H], keep input dtype
    v_row = v.reshape(1, H).astype(jnp.float32)                       # [1, H]

    if block_b is None:
        block_b = _pick_block_b(B, T, H, enc.dtype, vmem_budget_bytes)
    grid = (pl.cdiv(B, block_b),)

    # Optional deeper pipelining of the dominant enc stream (e.g. 3 on v5e when
    # the DMA is still exposed at the largest block that fits VMEM).
    enc_spec_kwargs = {}
    if enc_buffers is not None:
        enc_spec_kwargs["pipeline_mode"] = pl.Buffered(enc_buffers)
    enc_spec = pl.BlockSpec((T, block_b, H), lambda i: (0, i, 0), **enc_spec_kwargs)

    elt = jnp.dtype(enc.dtype).itemsize
    cost = pl.CostEstimate(
        flops=int(2 * B * T * H * H + 4 * B * T * H),
        transcendentals=int(B * T),
        bytes_accessed=int(B * T * H * elt + H * H * elt
                           + B * H * 4 + H * 4 + B * T * 4),
    )

    out = pl.pallas_call(
        attn_kernel,
        out_shape=jax.ShapeDtypeStruct((B, T), jnp.float32),
        grid=grid,
        in_specs=[
            enc_spec,                                          # enc  [T, B, H]
            pl.BlockSpec((block_b, H), lambda i: (i, 0)),      # h_proj
            pl.BlockSpec((H, H), lambda i: (0, 0)),            # W_e.T
            pl.BlockSpec((1, H), lambda i: (0, 0)),            # v row
        ],
        out_specs=pl.BlockSpec((block_b, T), lambda i: (i, 0)),
        compiler_params=pltpu.CompilerParams(
            dimension_semantics=("parallel",),
            vmem_limit_bytes=int(vmem_budget_bytes)),
        cost_estimate=cost,
    )(enc, h_proj, We_t, v_row)

    # TODO(synk): for production H (>=128, ideally multiples of 256) also tile the
    # output-H dimension of W_e and pad T to the sublane tile; toy sizes skip this.
    return out[:, None, :]                                            # [B, 1, T]


def attention_ref(hidden, encoder_outputs, W, b, v):
    """Pure-JAX reference mirroring the PyTorch forward (f32 math)."""
    T, B, H = encoder_outputs.shape
    enc = jnp.transpose(encoder_outputs, (1, 0, 2))
    h = jnp.broadcast_to(hidden[:, None, :], (B, T, H))
    x = jnp.concatenate([h, enc], axis=-1)
    energy = jax.nn.relu(
        jnp.einsum("btk,hk->bth", x, W, precision="highest") + b)     # [B, T, H]
    e = jnp.einsum("bth,h->bt", energy, v, precision="highest")       # [B, T]
    return jax.nn.softmax(e, axis=1)[:, None, :]                      # [B, 1, T]


if __name__ == "__main__":
    # Small but alignment-friendly shapes: B=32 lets the kernel run a 2-step
    # "parallel" grid with bf16-aligned batch blocks (block_b=16).
    B, T, H = 32, 8, 32

    key = jax.random.PRNGKey(0)
    k_hid, k_enc, k_w, k_b, k_v = jax.random.split(key, 5)

    hidden = jax.random.normal(k_hid, (B, H), dtype=jnp.float32)
    encoder_outputs = jax.random.normal(k_enc, (T, B, H), dtype=jnp.float32)

    # Parameter init per nn.Linear(2H, H) and v ~ N(0, 1/sqrt(H))
    bound = 1.0 / jnp.sqrt(2.0 * H)
    W = jax.random.uniform(k_w, (H, 2 * H), minval=-bound, maxval=bound,
                           dtype=jnp.float32)
    b = jax.random.uniform(k_b, (H,), minval=-bound, maxval=bound,
                           dtype=jnp.float32)
    v = (1.0 / jnp.sqrt(H)) * jax.random.normal(k_v, (H,), dtype=jnp.float32)

    # Per the perf review: keep the HBM-heavy operands (encoder outputs, attn
    # weight) in bf16; the kernel accumulates on the MXU in f32.
    enc_bf16 = encoder_outputs.astype(jnp.bfloat16)
    W_bf16 = W.astype(jnp.bfloat16)

    out = attention_forward(hidden, enc_bf16, W_bf16, b, v)
    out = jax.block_until_ready(out)

    # (a) tight check vs a reference run on the SAME bf16-quantized operands
    #     (isolates kernel error from quantization error),
    # (b) loose check vs the full-f32 reference (bf16 quantization only).
    ref_q = attention_ref(hidden, enc_bf16.astype(jnp.float32),
                          W_bf16.astype(jnp.float32), b, v)
    ref_f = attention_ref(hidden, encoder_outputs, W, b, v)

    assert out.shape == (B, 1, T), out.shape
    assert jnp.allclose(out, ref_q, atol=5e-4, rtol=1e-3), (
        "Pallas kernel mismatch vs quantized-input reference")
    assert jnp.allclose(out, ref_f, atol=5e-2, rtol=5e-2), (
        "Pallas kernel mismatch vs f32 reference")

    print("KERNEL_OK")
</pallas_src>

<mosaic_0001>
module attributes {stable_mosaic.version = 11 : i64} {
  func.func @attn_kernel(%arg0: i32, %arg1: memref<8x16x32xbf16, #tpu.memory_space<vmem>>, %arg2: memref<16x32xf32, #tpu.memory_space<vmem>>, %arg3: memref<32x32xbf16, #tpu.memory_space<vmem>>, %arg4: memref<1x32xf32, #tpu.memory_space<vmem>>, %arg5: memref<16x8xf32, #tpu.memory_space<vmem>>) attributes {dimension_semantics = [#tpu.dimension_semantics<parallel>], iteration_bounds = array<i64: 2>, scalar_prefetch = 0 : i64, scratch_operands = 0 : i64, tpu.core_type = #tpu.core_type<tc>, window_params = [{transform_indices = @transform_0, window_bounds = array<i64: 8, 16, 32>}, {transform_indices = @transform_1, window_bounds = array<i64: 16, 32>}, {pipeline_mode = #tpu.pipeline_mode<synchronous>, transform_indices = @transform_2, window_bounds = array<i64: 32, 32>}, {pipeline_mode = #tpu.pipeline_mode<synchronous>, transform_indices = @transform_3, window_bounds = array<i64: 1, 32>}, {transform_indices = @transform_4, window_bounds = array<i64: 16, 8>}]} {
    %c0 = arith.constant 0 : index
    %c0_0 = arith.constant 0 : index
    %c0_1 = arith.constant 0 : index
    %0 = vector.load %arg1[%c0, %c0_0, %c0_1] : memref<8x16x32xbf16, #tpu.memory_space<vmem>>, vector<8x16x32xbf16>
    %1 = vector.shape_cast %0 : vector<8x16x32xbf16> to vector<128x32xbf16>
    %c0_2 = arith.constant 0 : index
    %c0_3 = arith.constant 0 : index
    %2 = vector.load %arg3[%c0_2, %c0_3] : memref<32x32xbf16, #tpu.memory_space<vmem>>, vector<32x32xbf16>
    %cst = arith.constant dense<0.000000e+00> : vector<128x32xf32>
    %3 = tpu.matmul %1, %2, %cst {dimension_numbers = #tpu.dot_dimension_numbers<[1], [0], [0], [1], [0, 0, 1, 1], [], []>} : vector<128x32xbf16>, vector<32x32xbf16>, vector<128x32xf32> -> vector<128x32xf32>
    %4 = vector.shape_cast %3 : vector<128x32xf32> to vector<8x16x32xf32>
    %c0_4 = arith.constant 0 : index
    %c0_5 = arith.constant 0 : index
    %5 = vector.load %arg2[%c0_4, %c0_5] : memref<16x32xf32, #tpu.memory_space<vmem>>, vector<16x32xf32>
    %6 = vector.shape_cast %5 : vector<16x32xf32> to vector<1x16x32xf32>
    %7 = vector.broadcast %6 : vector<1x16x32xf32> to vector<8x16x32xf32>
    %8 = arith.addf %4, %7 : vector<8x16x32xf32>
    %cst_6 = arith.constant 0.000000e+00 : f32
    %9 = vector.broadcast %cst_6 : f32 to vector<8x16x32xf32>
    %10 = arith.maximumf %8, %9 : vector<8x16x32xf32>
    %c0_7 = arith.constant 0 : index
    %c0_8 = arith.constant 0 : index
    %11 = vector.load %arg4[%c0_7, %c0_8] : memref<1x32xf32, #tpu.memory_space<vmem>>, vector<1x32xf32>
    %12 = vector.shape_cast %11 : vector<1x32xf32> to vector<1x1x32xf32>
    %13 = vector.broadcast %12 : vector<1x1x32xf32> to vector<8x16x32xf32>
    %14 = arith.mulf %10, %13 : vector<8x16x32xf32>
    %cst_9 = arith.constant dense<0.000000e+00> : vector<8x16xf32>
    %15 = vector.multi_reduction <add>, %14, %cst_9 [2] : vector<8x16x32xf32> to vector<8x16xf32>
    %16 = tpu.transpose %15, [1, 0] : vector<8x16xf32> -> vector<16x8xf32>
    %cst_10 = arith.constant dense<0xFF800000> : vector<16xf32>
    %17 = vector.multi_reduction <maximumf>, %16, %cst_10 [1] : vector<16x8xf32> to vector<16xf32>
    %18 = vector.shape_cast %17 : vector<16xf32> to vector<16x1xf32>
    %19 = vector.broadcast %18 : vector<16x1xf32> to vector<16x8xf32>
    %20 = arith.subf %16, %19 : vector<16x8xf32>
    %21 = math.exp %20 : vector<16x8xf32>
    %cst_11 = arith.constant dense<0.000000e+00> : vector<16xf32>
    %22 = vector.multi_reduction <add>, %21, %cst_11 [1] : vector<16x8xf32> to vector<16xf32>
    %23 = vector.shape_cast %22 : vector<16xf32> to vector<16x1xf32>
    %24 = tpu.reciprocal %23 : vector<16x1xf32> -> vector<16x1xf32>
    %25 = vector.broadcast %24 : vector<16x1xf32> to vector<16x8xf32>
    %26 = arith.mulf %21, %25 : vector<16x8xf32>
    %c0_12 = arith.constant 0 : index
    %c0_13 = arith.constant 0 : index
    %27 = vector.load %arg5[%c0_12, %c0_13] : memref<16x8xf32, #tpu.memory_space<vmem>>, vector<16x8xf32>
    tpu.vector_store %arg5[%c0_12, %c0_13], %26 {strides = array<i32>} : memref<16x8xf32, #tpu.memory_space<vmem>>, vector<16x8xf32>,
    return
  }
  func.func @transform_0(%arg0: i32) -> (i32, i32, i32) {
    %c0_i32 = arith.constant 0 : i32
    %c0_i32_0 = arith.constant 0 : i32
    %c0_i32_1 = arith.constant 0 : i32
    return %c0_i32, %arg0, %c0_i32_0 : i32, i32, i32
  }
  func.func @transform_1(%arg0: i32) -> (i32, i32) {
    %c0_i32 = arith.constant 0 : i32
    %c0_i32_0 = arith.constant 0 : i32
    return %arg0, %c0_i32 : i32, i32
  }
  func.func @transform_2(%arg0: i32) -> (i32, i32) {
    %c0_i32 = arith.constant 0 : i32
    %c0_i32_0 = arith.constant 0 : i32
    %c0_i32_1 = arith.constant 0 : i32
    return %c0_i32, %c0_i32_0 : i32, i32
  }
  func.func @transform_3(%arg0: i32) -> (i32, i32) {
    %c0_i32 = arith.constant 0 : i32
    %c0_i32_0 = arith.constant 0 : i32
    %c0_i32_1 = arith.constant 0 : i32
    return %c0_i32, %c0_i32_0 : i32, i32
  }
  func.func @transform_4(%arg0: i32) -> (i32, i32) {
    %c0_i32 = arith.constant 0 : i32
    %c0_i32_0 = arith.constant 0 : i32
    return %arg0, %c0_i32 : i32, i32
  }
}

</mosaic_0001>

<bundles_post_ra>
// kernel: tpu_custom_call.1
= control target key start
LH: loop header
LB: loop body
LE: loop exit
PB: predicated region body
PF: predicated region fallthrough
CT: control target
= control target key end

     0   :  { %9 = vsyncpa [#allocation3], 0  ;;  %s1416_s0 = inlined_call_operand.hbm [shape: bf16[8,32,32], index: 0, kind: input, shape index: {}]   ;;  %s1417_s1 = inlined_call_operand.hbm [shape: f32[32,32], index: 1, kind: input, shape index: {}]   ;;  %s1418_s2 = inlined_call_operand.hbm [shape: bf16[32,32], index: 2, kind: input, shape index: {}]   ;;  %s1419_s3 = inlined_call_operand.vmem [shape: f32[1,32], index: 3, kind: input, shape index: {}]   ;;  %s1420_s4 = inlined_call_operand.vmem [shape: f32[32,8], index: 4, kind: output, shape index: {}]  }
   0x1   :  { %11 = vsyncpa [#allocation3 + $0x1], 0 }
   0x2   :  { %12 = vsyncpa [#allocation5], 0 }
   0x3   :  { %14 = vsyncpa [#allocation5 + $0x1], 0  ;;  %s1159_s15 = smov 0   ;;  %s1161_s16 = smov 0  }
   0x4   :  { %s1163_s17 = smov 0   ;;  %s1165_s18 = smov 0  }
   0x5 LB: > { %s1178_s19 = sadd.s32 4294967295, %s1120_s18   ;;  %s1181_s20 = sadd.s32 1, %s1120_s18   ;;  %s1120_s18 = sphi %s1165_s18, %s1437_s18   ;;  %s1116_s17 = sphi %s1163_s17, %s1436_s17   ;;  %s1112_s16 = sphi %s1161_s16, %s1435_s16   ;;  %s1108_s15 = sphi %s1159_s15, %s1434_s15  }
   0x6   : > { %s24_s21 = ssub.s32 %s1120_s18, %s1181_s20  ;;  %s27_s22 = sadd.s32 1, %s1116_s17 }
   0x7   : > { %p25_p0 = scmp.eq.s32.totalorder %s24_s21, 0  ;;  %p34_p1 = scmp.ne.s32.totalorder %s1116_s17, %s1112_s16 }
   0x8   : > { %p35_p2 = scmp.eq.s32.totalorder %s1120_s18, 0  ;;  %p40_p3 = scmp.ne.s32.totalorder %s1112_s16, %s1108_s15 }
   0x9   : > { %s1191_s23 = scalar_select %p25_p0, %s1116_s17, %s27_s22  }
   0xa   : > { %p1193_p4 = por %p35_p2, %p34_p1  ;;  %p1421_p5 = scmp.eq.s32.totalorder %s1178_s19, 0 }
   0xb   : > { %p865_p6 = scmp.ge.s32.totalorder %s1120_s18, 1  ;;  %p145_p7 = scmp.lt.s32.totalorder %s1120_s18, 3 }
   0xc   : > { %s1425_s24 = scalar_select %p1193_p4, 1, 0 }
   0xd   : > { %p1202_p8 = por %p1421_p5, %p40_p3  ;;  %p1206_p9 = pnand %p865_p6, %p145_p7 }
   0xe   : > { %s1122_s27 = smov [#allocation6]   ;;  %s1022_s6 = scalar_lea.hbm %s1418_s2, 256 }
   0xf   : > { %s1426_s25 = scalar_select %p1202_p8, 1, 0 }
  0x10   : > { %s1427_s26 = scalar_select %p1206_p9, 1, 0 }
  0x11   : > { %s157_s28 = sshll.u32 %s1122_s27, 4  ;;  %p954_p10 = pneg %p1206_p9  ;;  %s158_s28 = int_to_ptr.vmem [resolvable:$true] %s157_s28 }
  0x12   : > { %p1023_p12 = scmp.ne.s32.totalorder %s1418_s2, %s1022_s6  ;;  %p1029_p2 = scmp.lt.u32.totalorder %s1022_s6, %s1418_s2 }
  0x13   : > { %p1214_p11 = pnand %p954_p10, %p1421_p5 }
  0x15   : > { %p1024_p13 = pneg %p1214_p11 }
  0x17   : > { %p1025_p0 = pnand %p1024_p13, %p1023_p12 }
  0x19   : > { %p1026_p1 = pneg %p1025_p0 }
  0x1b   : > { %p1031_p3 = pnand %p1029_p2, %p1026_p1 }
  0x1d   : > { %1034 = shalt.err (!%p1031_p3)
}
  0x1e   : > { %s1035_s11 = scalar_lea.vmem %s158_s28, 256  ;;  %p1043_p5 = scmp.lt.s32.totalorder %s158_s28, %s158_s28 }
  0x1f   : > { %p1036_p6 = scmp.ne.s32.totalorder %s158_s28, %s1035_s11  ;;  %p1044_p8 = scmp.lt.s32.totalorder %s1035_s11, %s1035_s11 }
  0x21   : > { %p1038_p7 = pnand %p1036_p6, %p1024_p13  ;;  %p1045_p9 = por %p1044_p8, %p1043_p5 }
  0x23   : > { %p1039_p10 = pneg %p1038_p7 }
  0x25   : > { %p1046_p4 = pnand %p1045_p9, %p1039_p10 }
  0x27   : > { %1049 = shalt.err (!%p1046_p4)
}
  0x28   : > { %s1123_s12 = smov 64   ;;  %s1124_s13 = smov 4  }
  0x29   : > { %957 = dma.hbm_to_vmem [thread:$0]  (!%p1214_p11), %s1418_s2, 256, %s158_s28, [#allocation5], %s1123_s12, %s1123_s12, %s1124_s13  }
  0x2a   : > { %p867_p12 = scmp.ge.s32.totalorder %s1120_s18, 2 }
  0x2c   : > { %170 = sbr.rel (%p867_p12) target bundleno = 91 (0x5b), region = 24 }
  0x33   : > { %s174_s21 = sand.u32 1, %s1116_s17   ;;  %s903_s22 = sshll.u32 %s1120_s18, 7 }
  0x34   : > { %s868_s27 = sshll.u32 %s174_s21, 6  ;;  %s184_s5 = scalar_lea.hbm %s1416_s0, %s903_s22 }
  0x35   : > { %p1429_p4 = scmp.ne.s32.totalorder %s1425_s24, 0  ;;  %s178_s6 = scalar_lea.vmem [#allocation2], %s868_s27 }
  0x36   : > { %s197_s7 = sshll.u32 %s178_s6, 4  ;;  %s1125_s9 = smov 256   ;;  %s198_s7 = int_to_ptr.vmem [resolvable:$true] %s197_s7 }
  0x37   : > { %s941_s28 = scalar_select %p1429_p4, [#allocation0], [#allocation9] }
  0x38   : > { %942 = sst [smem:[#allocation8]] (%p1429_p4), %s1125_s9  ;;  %s1126_s10 = smov 128  }
  0x39   : > { %s189_s8 = sld [smem:[%s941_s28]]   ;;  %s1127_s11 = smov 2  }
  0x3a   : > { %943 = sst [smem:[#allocation8 + $0x1]] (%p1429_p4), %s1126_s10  ;;  %s1128_s12 = smov 64  }
  0x3b   : > { %944 = sst [smem:[#allocation8 + $0x2]] (%p1429_p4), %s1127_s11  ;;  %s1129_s14 = smov 4  }
  0x3c   : > { %945 = sst [smem:[#allocation8 + $0x3]] (%p1429_p4), %s1128_s12  ;;  %s175_s22 = scalar_lea.sflag [#allocation3], %s174_s21 }
  0x3d   : > { %946 = sst [smem:[#allocation8 + $0x4]] (%p1429_p4), %s1128_s12  ;;  %s1130_s27 = smov [#allocation7]  }
  0x3e   : > { %947 = sst [smem:[#allocation8 + $0x5]] (%p1429_p4), %s1129_s14  ;;  %s220_s30 = sand.u32 1, %s1120_s18  }
  0x3f   : > { %s871_s13 = sshll.u32 %s189_s8, 26  ;;  %s873_s29 = sshll.u32 %s174_s21, 4 }
  0x40   : > { %s872_s15 = sadd.s32 134217728, %s871_s13  ;;  %s904_s28 = sshll.u32 %s1120_s18, 8 }
  0x41   : > { %948 = dma.general (%p1429_p4), %s184_s5, 1024, %s198_s7, %s175_s22, %s1130_s27, [#allocation8], %s872_s15, 0  }
  0x42   : > { %s224_s6 = scalar_lea.vmem [#allocation4], %s873_s29  ;;  %s1261_s8 = scalar_lea.hbm %s1417_s1, %s904_s28 }
  0x43   : > { %s231_s9 = sshll.u32 %s224_s6, 4  ;;  %s1265_s5 = scalar_lea.sflag [#allocation5], %s220_s30  ;;  %s1263_s9 = int_to_ptr.vmem [resolvable:$true] %s231_s9 }
  0x44   : > { %s1050_s7 = scalar_lea.hbm %s1261_s8, 256  ;;  %s1054_s12 = scalar_lea.hbm %s1417_s1, 512 }
  0x45   : > { %p1051_p5 = scmp.ne.s32.totalorder %s1261_s8, %s1050_s7  ;;  %p1055_p11 = scmp.lt.u32.totalorder %s1261_s8, %s1417_s1 }
  0x46   : > { %p1056_p13 = scmp.lt.u32.totalorder %s1054_s12, %s1050_s7  ;;  %p1058_p1 = scmp.lt.u32.totalorder %s1050_s7, %s1261_s8 }
  0x47   : > { %p1052_p8 = pnand %p1051_p5, %p1429_p4 }
  0x48   : > { %p1057_p0 = por %p1056_p13, %p1055_p11 }
  0x49   : > { %p1053_p9 = pneg %p1052_p8 }
  0x4a   : > { %p1059_p2 = por %p1058_p1, %p1057_p0 }
  0x4c   : > { %p1060_p3 = pnand %p1059_p2, %p1053_p9 }
  0x4e   : > { %1063 = shalt.err (!%p1060_p3)
}
  0x4f   : > { %s1064_s15 = scalar_lea.vmem %s1263_s9, 256  ;;  %s1131_s22 = smov [#allocation4]  }
  0x50   : > { %p1065_p6 = scmp.ne.s32.totalorder %s1263_s9, %s1064_s15  ;;  %s1068_s27 = sshll.u32 %s1131_s22, 4  ;;  %s1069_s27 = int_to_ptr.vmem [resolvable:$false] %s1068_s27 }
  0x51   : > { %s1070_s30 = scalar_lea.vmem %s1069_s27, 512  ;;  %p1071_p12 = scmp.lt.s32.totalorder %s1263_s9, %s1069_s27 }
  0x52   : > { %p1066_p7 = pnand %p1065_p6, %p1429_p4  ;;  %p1072_p5 = scmp.lt.s32.totalorder %s1070_s30, %s1064_s15 }
  0x54   : > { %p1067_p10 = pneg %p1066_p7  ;;  %p1073_p8 = por %p1072_p5, %p1071_p12 }
  0x56   : > { %p1074_p11 = pnand %p1073_p8, %p1067_p10 }
  0x58   : > { %1077 = shalt.err (!%p1074_p11)
}
  0x59   : > { %s1132_s29 = smov 128   ;;  %s1133_s28 = smov 8  }
  0x5a   : > { %949 = dma.hbm_to_vmem [thread:$0]  (%p1429_p4), %s1261_s8, 256, %s1263_s9, %s1265_s5, %s1132_s29, %s1132_s29, %s1133_s28  }
  0x5b PF: > { %p1430_p9 = scmp.ne.s32.totalorder %s1427_s26, 0 }
  0x5c   : > { %s245_s6 = sand.u32 (!%p1430_p9), 1, %s1112_s16   ;;  %p1431_p13 = scmp.ne.s32.totalorder (!%p1430_p9), %s1426_s25, 0 }
  0x5d   : > { %243 = sbr.rel (%p1430_p9) target bundleno = 957 (0x3bd), region = 36  ;;  %s877_s10 = sshll.u32 (!%p1430_p9), %s245_s6, 6 }
  0x5e   : > { %s246_s11 = scalar_lea.sflag (!%p1430_p9), [#allocation3], %s245_s6  ;;  %s1292_s7 = scalar_lea.vmem (!%p1430_p9), [#allocation2], %s877_s10 }
  0x64   : > { %1095 = dma.done.wait (%p1431_p13), %s246_s11, 1024  }
  0x65   : > { %1097 = vsyncadd (%p1431_p13), %s246_s11, 4294966272  ;;  %s254_s24 = sand.u32 1, %s1178_s19   ;;  %s878_s9 = sshll.u32 %s245_s6, 4 }
  0x66   : > { %s255_s8 = scalar_lea.sflag [#allocation5], %s254_s24  ;;  %s1299_s5 = scalar_lea.vmem [#allocation4], %s878_s9 }
  0x67   : > { %1099 = dma.done.wait (%p1431_p13), %s255_s8, 256  }
  0x68   : > { %1101 = vsyncadd (%p1431_p13), %s255_s8, 4294967040  ;;  %p1432_p4 = scmp.eq.s32.totalorder %s1178_s19, 0 }
  0x6a   : > { %1103 = dma.done.wait (%p1432_p4), [#allocation5], 256   ;;  %p1433_p0 = pmov %p1432_p4 }
  0x6b   : > { %v1004_v0 = vld [vmem:[#allocation6] sm:$0xff]   ;;  %v1005_v1 = vld [vmem:[#allocation6 + $0x8] sm:$0xff]   ;;  %vm373_vm0 = vcmask 261120   ;;  %v1010_v6 = vld [vmem:[%s1292_s7 + $0x10] sm:$0xff]   ;;  %vm627_vm1 = vcmask 130112   ;;  %vm692_vm2 = vcmask 1041409  }
  0x6c   : > { %1105 = vsyncadd (%p1433_p0), [#allocation5], 4294967040  ;;  %915 = vmatprep.subr.bf16.mxu0 %v1004_v0  ;;  %935 = vmatprep.subr.bf16.mxu1 %v1004_v0  ;;  %v1006_v2 = vld [vmem:[%s1292_s7] sm:$0xff]   ;;  %v1008_v4 = vld [vmem:[%s1292_s7 + $0x8] sm:$0xff]   ;;  %vm694_vm3 = vcmask 1042434   ;;  %vm696_vm4 = vcmask 1043459  }
  0x6d   : > { %916 = vmatpush3.bf16.msra.mxu0 %v1004_v0  ;;  %937 = vmatpush3.bf16.msra.mxu1 %v1004_v0  ;;  %v1007_v3 = vld [vmem:[%s1292_s7 + $0x20] sm:$0xff]   ;;  %v1009_v5 = vld [vmem:[%s1292_s7 + $0x28] sm:$0xff]   ;;  %v1012_v7 = vld [vmem:[%s1292_s7 + $0x30] sm:$0xff]   ;;  %vm698_vm5 = vcmask 1044484   ;;  %vm700_vm6 = vcmask 1045509   ;;  %vm702_vm7 = vcmask 1046534  }
  0x6e   : > { %917 = vmatprep.subr.bf16.mxu0 %v1005_v1  ;;  %936 = vmatprep.subr.bf16.mxu1 %v1005_v1  ;;  %v1011_v8 = vld [vmem:[%s1292_s7 + $0x18] sm:$0xff]   ;;  %v1326_v10 = vld [vmem:[%s1299_s5] sm:$0xff]  ;;  %vm704_vm8 = vcmask 1047559   ;;  %vm739_vm9 = vcmask 64512   ;;  %s880_s18 = sshll.u32 %s1178_s19, 1 }
  0x6f   : > { %919 = vmatprep.mubr.msk.bf16.mxu0 %vm373_vm0, %v1006_v2  ;;  %927 = vmatprep.mubr.msk.bf16.mxu1 %vm373_vm0, %v1007_v3  ;;  %v1013_v9 = vld [vmem:[%s1292_s7 + $0x38] sm:$0xff]   ;;  %v1338_v22 = vld [vmem:[%s1419_s3] ss:$0 sm:$0xff]  ;;  %p295_p1 = scmp.lt.s32.totalorder %s880_s18, 3 }
  0x70   : > { %v1329_v13 = vld [vmem:[%s1299_s5 + $0x8] sm:$0xff] }
  0x71   : > { %918 = vmatpush3.bf16.msra.mxu0 %v1005_v1  ;;  %938 = vmatpush3.bf16.msra.mxu1 %v1005_v1  ;;  %s1439_s18 = smov (!%p295_p1, %s880_s18), 3 }
  0x72   : > { %s881_s21 = sshll.u32 %s1439_s18, 3 }
  0x73   : > { %s298_s14 = scalar_lea.vmem %s1420_s4, %s881_s21 }
  0x74   : > { %920 = vmatmul.mubr.msk.bf16.vlgmr.msra.gmra.mrb[0].mxu0 %vm373_vm0, %v1008_v4  ;;  %928 = vmatmul.mubr.msk.bf16.vlgmr.msra.gmra.mrb[0].mxu1 %vm373_vm0, %v1009_v5 }
  0x75   : > { %923 = vmatprep.mubr.msk.bf16.mxu0 %vm373_vm0, %v1010_v6  ;;  %931 = vmatprep.mubr.msk.bf16.mxu1 %vm373_vm0, %v1012_v7 }
  0x7c   : > { %924 = vmatmul.mubr.msk.bf16.gmra.mrb[4].mxu0 %vm373_vm0, %v1011_v8  ;;  %932 = vmatmul.mubr.msk.bf16.gmra.mrb[4].mxu1 %vm373_vm0, %v1013_v9 }
 0x147   : > { %v921_v11 = vpop.f32.mrb[0].mxu0  ;;  %v929_v12 = vpop.f32.mrb[0].mxu1 }
 0x148   : > { %v499_v14 = vadd.f32 %v921_v11, %v1326_v10  ;;  %v507_v15 = vadd.f32 %v929_v12, %v1326_v10  ;;  %v432_v16 = vpop.f32.mrb[1].mxu0  ;;  %v464_v17 = vpop.f32.mrb[1].mxu1 }
 0x149   : > { %v497_v18 = vadd.f32 %v1326_v10, %v432_v16  ;;  %v505_v19 = vadd.f32 %v1326_v10, %v464_v17  ;;  %v922_v20 = vpop.f32.mrb[2].mxu0  ;;  %v930_v21 = vpop.f32.mrb[2].mxu1 }
 0x14a   : > { %v515_v23 = vmax.f32 %v499_v14, 0.0  ;;  %v523_v24 = vmax.f32 %v507_v15, 0.0  ;;  %v500_v25 = vadd.f32 %v922_v20, %v1329_v13  ;;  %v508_v26 = vadd.f32 %v930_v21, %v1329_v13  ;;  %v435_v27 = vpop.f32.mrb[3].mxu0  ;;  %v467_v28 = vpop.f32.mrb[3].mxu1 }
 0x14b   : > { %v513_v29 = vmax.f32 %v497_v18, 0.0  ;;  %v521_v33 = vmax.f32 %v505_v19, 0.0  ;;  %v498_v35 = vadd.f32 %v1329_v13, %v435_v27  ;;  %v506_v36 = vadd.f32 %v1329_v13, %v467_v28 }
 0x14c   : > { %v516_v30 = vmax.f32 %v500_v25, 0.0  ;;  %v546_v31 = vmul.f32 %v1338_v22, %v523_v24  ;;  %v538_v32 = vmul.f32 %v1338_v22, %v515_v23  ;;  %v524_v34 = vmax.f32 %v508_v26, 0.0 }
 0x14d   : > { %v536_v39 = vmul.f32 %v1338_v22, %v513_v29  ;;  %v514_v45 = vmax.f32 %v498_v35, 0.0  ;;  %v522_v46 = vmax.f32 %v506_v36, 0.0  ;;  %v544_v48 = vmul.f32 %v1338_v22, %v521_v33 }
 0x14e   : > { %v582_v37 = vsel %vm373_vm0, %v546_v31, 0.0  ;;  %v558_v38 = vsel %vm373_vm0, %v538_v32, 0.0  ;;  %v539_v40 = vmul.f32 %v1338_v22, %v516_v30  ;;  %v547_v49 = vmul.f32 %v1338_v22, %v524_v34 }
 0x14f   : > { %583 = vadd.xlane.f32.xlu0 %v582_v37  ;;  %559 = vadd.xlane.f32.xlu1 %v558_v38  ;;  %v925_v41 = vpop.f32.mrb[4].mxu0  ;;  %v933_v42 = vpop.f32.mrb[4].mxu1  ;;  %v552_v52 = vsel %vm373_vm0, %v536_v39, 0.0  ;;  %v576_v57 = vsel %vm373_vm0, %v544_v48, 0.0  ;;  %v545_v59 = vmul.f32 %v1338_v22, %v522_v46  ;;  %v537_v60 = vmul.f32 %v1338_v22, %v514_v45 }
 0x150   : > { %v448_v43 = vpop.f32.mrb[5].mxu0  ;;  %v480_v44 = vpop.f32.mrb[5].mxu1  ;;  %v503_v51 = vadd.f32 %v925_v41, %v1326_v10  ;;  %v561_v53 = vsel %vm373_vm0, %v539_v40, 0.0  ;;  %v585_v58 = vsel %vm373_vm0, %v547_v49, 0.0  ;;  %v511_v9 = vadd.f32 %v933_v42, %v1326_v10 }
 0x151   : > { %v926_v47 = vpop.f32.mrb[6].mxu0  ;;  %v934_v50 = vpop.f32.mrb[6].mxu1  ;;  %v501_v62 = vadd.f32 %v1326_v10, %v448_v43  ;;  %v509_v1 = vadd.f32 %v1326_v10, %v480_v44  ;;  %v579_v2 = vsel %vm373_vm0, %v545_v59, 0.0  ;;  %v555_v3 = vsel %vm373_vm0, %v537_v60, 0.0 }
 0x152   : > { %v504_v54 = vadd.f32 %v926_v47, %v1329_v13  ;;  %v451_v55 = vpop.f32.mrb[7].mxu0  ;;  %v483_v56 = vpop.f32.mrb[7].mxu1  ;;  %v519_v61 = vmax.f32 %v503_v51, 0.0  ;;  %v512_v12 = vadd.f32 %v934_v50, %v1329_v13  ;;  %v527_v19 = vmax.f32 %v511_v9, 0.0 }
 0x153   : > { %553 = vadd.xlane.f32.xlu0 %v552_v52  ;;  %562 = vadd.xlane.f32.xlu1 %v561_v53  ;;  %v502_v0 = vadd.f32 %v1329_v13, %v451_v55  ;;  %v510_v4 = vadd.f32 %v1329_v13, %v483_v56  ;;  %v517_v5 = vmax.f32 %v501_v62, 0.0  ;;  %v525_v11 = vmax.f32 %v509_v1, 0.0 }
 0x154   : > { %v520_v63 = vmax.f32 %v504_v54, 0.0  ;;  %v542_v7 = vmul.f32 %v1338_v22, %v519_v61  ;;  %v528_v20 = vmax.f32 %v512_v12, 0.0  ;;  %v550_v26 = vmul.f32 %v1338_v22, %v527_v19 }
 0x155   : > { %v518_v6 = vmax.f32 %v502_v0, 0.0  ;;  %v526_v14 = vmax.f32 %v510_v4, 0.0  ;;  %v540_v17 = vmul.f32 %v1338_v22, %v517_v5  ;;  %v548_v23 = vmul.f32 %v1338_v22, %v525_v11 }
 0x156   : > { %v543_v8 = vmul.f32 %v1338_v22, %v520_v63  ;;  %v570_v15 = vsel %vm373_vm0, %v542_v7, 0.0  ;;  %v551_v27 = vmul.f32 %v1338_v22, %v528_v20  ;;  %v594_v28 = vsel %vm373_vm0, %v550_v26, 0.0 }
 0x157   : > { %577 = vadd.xlane.f32.xlu0 %v576_v57  ;;  %586 = vadd.xlane.f32.xlu1 %v585_v58  ;;  %v541_v18 = vmul.f32 %v1338_v22, %v518_v6  ;;  %v564_v21 = vsel %vm373_vm0, %v540_v17, 0.0  ;;  %v549_v13 = vmul.f32 %v1338_v22, %v526_v14  ;;  %v588_v24 = vsel %vm373_vm0, %v548_v23, 0.0 }
 0x158   : > { %v573_v16 = vsel %vm373_vm0, %v543_v8, 0.0  ;;  %v597_v29 = vsel %vm373_vm0, %v551_v27, 0.0  ;;  %v616_v32 = vlaneseq }
 0x159   : > { %v567_v10 = vsel %vm373_vm0, %v541_v18, 0.0  ;;  %v591_v25 = vsel %vm373_vm0, %v549_v13, 0.0 }
 0x15a   : > { %v617_v35 = vand.u32 127, %v616_v32  ;;  %v619_v39 = vshrl.u32 %v616_v32, 7 }
 0x15b   : > { %580 = vadd.xlane.f32.xlu1 %v579_v2  ;;  %556 = vadd.xlane.f32.xlu0 %v555_v3 }
 0x15c   : > { %v622_v38 = vadd.s32 4294967288, %v617_v35  ;;  %v620_v42 = vsub.s32 %v617_v35, %v619_v39 }
 0x15e   : > { %v625_v41 = vsub.s32 %v622_v38, %v619_v39 }
 0x15f   : > { %571 = vadd.xlane.f32.xlu0 %v570_v15  ;;  %574 = vadd.xlane.f32.xlu1 %v573_v16 }
 0x163   : > { %565 = vadd.xlane.f32.xlu0 %v564_v21  ;;  %568 = vadd.xlane.f32.xlu1 %v567_v10 }
 0x167   : > { %589 = vadd.xlane.f32.xlu0 %v588_v24  ;;  %592 = vadd.xlane.f32.xlu1 %v591_v25 }
 0x16b   : > { %595 = vadd.xlane.f32.xlu0 %v594_v28  ;;  %598 = vadd.xlane.f32.xlu1 %v597_v29 }
 0x1dc   : > { %v584_v30 = vpop.xlane.xlu0 %583  ;;  %v560_v31 = vpop.xlane.xlu1 %559 }
 0x1dd   : > { %v632_v48 = vrot.slane %v560_v31, %v620_v42  ;;  %v668_v62 = vrot.slane %v584_v30, %v620_v42 }
 0x1e0   : > { %v554_v33 = vpop.xlane.xlu0 %553  ;;  %v563_v34 = vpop.xlane.xlu1 %562 }
 0x1e1   : > { %v621_v46 = vrot.slane %v554_v33, %v620_v42  ;;  %v636_v47 = vrot.slane %v563_v34, %v625_v41 }
 0x1e3   : > { %v637_v57 = vsel %vm627_vm1, %v636_v47, %v632_v48 }
 0x1e4   : > { %v578_v36 = vpop.xlane.xlu0 %577  ;;  %v587_v37 = vpop.xlane.xlu1 %586 }
 0x1e5   : > { %v659_v58 = vrot.slane %v578_v36, %v620_v42  ;;  %v672_v59 = vrot.slane %v587_v37, %v625_v41 }
 0x1e7   : > { %v673_v8 = vsel %vm627_vm1, %v672_v59, %v668_v62 }
 0x1e8   : > { %v581_v40 = vpop.xlane.xlu1 %580  ;;  %v557_v22 = vpop.xlane.xlu0 %556 }
 0x1e9   : > { %v626_v43 = vrot.slane %v557_v22, %v625_v41  ;;  %v663_v54 = vrot.slane %v581_v40, %v625_v41 }
 0x1eb   : > { %v628_v49 = vsel %vm627_vm1, %v626_v43, %v621_v46  ;;  %v664_v3 = vsel %vm627_vm1, %v663_v54, %v659_v58 }
 0x1ec   : > { %v572_v44 = vpop.xlane.xlu0 %571  ;;  %v575_v45 = vpop.xlane.xlu1 %574  ;;  %v693_v60 = vsel %vm692_vm2, %v637_v57, %v628_v49 }
 0x1ed   : > { %v650_v50 = vrot.slane %v572_v44, %v620_v42  ;;  %v654_v51 = vrot.slane %v575_v45, %v625_v41 }
 0x1ef   : > { %v655_v63 = vsel %vm627_vm1, %v654_v51, %v650_v50 }
 0x1f0   : > { %v566_v52 = vpop.xlane.xlu0 %565  ;;  %v569_v53 = vpop.xlane.xlu1 %568 }
 0x1f1   : > { %v641_v55 = vrot.slane %v566_v52, %v620_v42  ;;  %v645_v56 = vrot.slane %v569_v53, %v625_v41 }
 0x1f3   : > { %v646_v61 = vsel %vm627_vm1, %v645_v56, %v641_v55 }
 0x1f4   : > { %v695_v0 = vsel %vm694_vm3, %v646_v61, %v693_v60  ;;  %v590_v1 = vpop.xlane.xlu0 %589  ;;  %v593_v2 = vpop.xlane.xlu1 %592 }
 0x1f5   : > { %v677_v4 = vrot.slane %v590_v1, %v620_v42  ;;  %v681_v5 = vrot.slane %v593_v2, %v625_v41  ;;  %v697_v6 = vsel %vm696_vm4, %v655_v63, %v695_v0 }
 0x1f6   : > { %v699_v7 = vsel %vm698_vm5, %v664_v3, %v697_v6 }
 0x1f7   : > { %v682_v12 = vsel %vm627_vm1, %v681_v5, %v677_v4  ;;  %v701_v14 = vsel %vm700_vm6, %v673_v8, %v699_v7 }
 0x1f8   : > { %v596_v9 = vpop.xlane.xlu0 %595  ;;  %v599_v11 = vpop.xlane.xlu1 %598  ;;  %v703_v18 = vsel %vm702_vm7, %v682_v12, %v701_v14 }
 0x1f9   : > { %v686_v15 = vrot.slane %v596_v9, %v620_v42  ;;  %v690_v16 = vrot.slane %v599_v11, %v625_v41 }
 0x1fb   : > { %v691_v17 = vsel %vm627_vm1, %v690_v16, %v686_v15 }
 0x1fc   : > { %v705_v19 = vsel %vm704_vm8, %v691_v17, %v703_v18 }
 0x1fd   : > { %707 = vxpose.xlu0.b32.start.end [1/1] (short) (narrow) %v705_v19, 16 }
 0x27d   : > { %v723_v20 = vpop.trf.xlu0 }
 0x27e   : > { %v740_v21 = vsel %vm739_vm9, %v723_v20, -inf }
 0x27f   : > { %741 = vmax.xlane.f32.xlu1 %v740_v21 }
 0x281   : > { %v724_v10 = vpop.trf.xlu0 }
 0x282   : > { %v743_v23 = vsel %vm739_vm9, %v724_v10, -inf }
 0x283   : > { %744 = vmax.xlane.f32.xlu1 %v743_v23 }
 0x30c   : > { %v742_v13 = vpop.xlane.xlu1 %741 }
 0x30d   : > { %v746_v24 = vsub.f32 %v723_v20, %v742_v13 }
 0x30f   : > { %v748_v25 = vmul.f32 1.442695, %v746_v24 }
 0x310   : > { %v745_v26 = vpop.xlane.xlu1 %744 }
 0x311   : > { %1014 = vpow2.f32 %v748_v25  ;;  %v747_v27 = vsub.f32 %v724_v10, %v745_v26 }
 0x313   : > { %v750_v28 = vmul.f32 1.442695, %v747_v27 }
 0x315   : > { %1016 = vpow2.f32 %v750_v28 }
 0x31b   : > { %v1015_v29 = vpop.eup %1014 }
 0x31c   : > { %v752_v30 = vsel %vm739_vm9, %v1015_v29, 0.0 }
 0x31d   : > { %753 = vadd.xlane.f32.xlu1 %v752_v30 }
 0x31f   : > { %v1017_v31 = vpop.eup %1016 }
 0x320   : > { %v755_v32 = vsel %vm739_vm9, %v1017_v31, 0.0 }
 0x321   : > { %756 = vadd.xlane.f32.xlu1 %v755_v32 }
 0x3aa   : > { %v754_v33 = vpop.xlane.xlu1 %753 }
 0x3ab   : > { %1018 = vrcp.f32 %v754_v33 }
 0x3ae   : > { %v757_v34 = vpop.xlane.xlu1 %756 }
 0x3af   : > { %1020 = vrcp.f32 %v757_v34 }
 0x3b5   : > { %v1019_v35 = vpop.eup %1018 }
 0x3b6   : > { %v760_v36 = vmul.f32 %v1019_v35, %v1015_v29 }
 0x3b8   : > { %762 = vst.msk [vmem:[%s298_s14] sm:$0xff] %vm739_vm9, %v760_v36 }
 0x3b9   : > { %v1021_v37 = vpop.eup %1020 }
 0x3ba   : > { %v761_v38 = vmul.f32 %v1021_v37, %v1017_v31 }
 0x3bc   : > { %763 = vst.msk [vmem:[%s298_s14 + $0x8] sm:$0xff] %vm739_vm9, %v761_v38 }
 0x3bd PF: > { %p17_p2 = scmp.ge.s32.totalorder %s1181_s20, 4   ;;  %s1434_s15 = smov %s1112_s16 }
 0x3be   : > { %s1435_s16 = smov %s1116_s17  ;;  %s1436_s17 = smov %s1191_s23 }
 0x3bf   : > { %s1437_s18 = smov %s1181_s20  ;;  %19 = sbr.rel (!%p17_p2) target bundleno = 5 (0x5), region = 98 }
 0x3c6   :  { %786 = vsyncpa [#allocation3], 1 }
 0x3c7   :  { %788 = vsyncpa [#allocation3 + $0x1], 1 }
 0x3c8   :  { %789 = vsyncpa [#allocation5], 1 }
 0x3c9   :  { %791 = vsyncpa [#allocation5 + $0x1], 1 }

</bundles_post_ra>
